<compile_context>
chip_gen: v7x
topology: tpu7x:2x2x1
jax: 0.10.0
libtpu: 0.0.40
codegen_flags: <defaults>
</compile_context>

<pallas_src>
import jax
import jax.numpy as jnp
from jax.experimental import pallas as pl
from jax.experimental.pallas import tpu as pltpu


def _round_up(n, m):
    return ((n + m - 1) // m) * m


# --------------------------------------------------------------------------- #
# Kernel body: one batch tile, full (padded) feature dims.
# --------------------------------------------------------------------------- #
def encoder_roi_kernel(x_ref, w1_ref, b1_ref, w2_ref, b2_ref, w3_ref, b3_ref,
                       out_ref):
    x = x_ref[...]  # bf16 (TB, in_dim)

    # fcs[0]: Linear(in_dim, hidden) + ReLU   (bf16 matmul, f32 accumulate)
    h1 = jnp.dot(x, w1_ref[...], preferred_element_type=jnp.float32) + b1_ref[...]
    h1 = jnp.maximum(h1, 0.0)

    # fcs[2]: Linear(hidden, hidden // 2) + ReLU
    h2 = jnp.dot(h1.astype(jnp.bfloat16), w2_ref[...],
                 preferred_element_type=jnp.float32) + b2_ref[...]
    h2 = jnp.maximum(h2, 0.0)

    # fcs[4]: Linear(hidden // 2, latent)
    z = jnp.dot(h2.astype(jnp.bfloat16), w3_ref[...],
                preferred_element_type=jnp.float32) + b3_ref[...]

    # F.normalize(z, dim=1): z / max(||z||_2, 1e-12) == z * rsqrt(max(sq, 1e-24))
    sq = jnp.sum(z * z, axis=1, keepdims=True)      # XLU cross-lane reduce
    inv = jax.lax.rsqrt(jnp.maximum(sq, 1e-24))     # EUP slot, not a VALU divide
    out_ref[...] = (z * inv).astype(out_ref.dtype)


# --------------------------------------------------------------------------- #
# One-time parameter preparation (pad output dims to 128, cast to bf16).
# Call once at load time and reuse the result across forward calls.
# --------------------------------------------------------------------------- #
def prepare_params(params):
    w1, b1, w2, b2, w3, b3 = params
    in_dim, hidden = w1.shape
    half = w2.shape[1]
    latent = w3.shape[1]

    hid_p = _round_up(hidden, 128)
    half_p = _round_up(half, 128)
    lat_p = _round_up(latent, 128)

    bf16, f32 = jnp.bfloat16, jnp.float32

    # x keeps its unpadded feature dim (full-extent last dim is exempt from the
    # 128 rule), so w1 only needs padding along its output (hidden) columns.
    w1p = jnp.zeros((in_dim, hid_p), bf16).at[:, :hidden].set(w1.astype(bf16))
    b1p = jnp.zeros((1, hid_p), f32).at[:, :hidden].set(
        b1.astype(f32).reshape(1, -1))
    w2p = jnp.zeros((hid_p, half_p), bf16).at[:hidden, :half].set(w2.astype(bf16))
    b2p = jnp.zeros((1, half_p), f32).at[:, :half].set(
        b2.astype(f32).reshape(1, -1))
    w3p = jnp.zeros((half_p, lat_p), bf16).at[:half, :latent].set(w3.astype(bf16))
    b3p = jnp.zeros((1, lat_p), f32).at[:, :latent].set(
        b3.astype(f32).reshape(1, -1))

    dims = dict(in_dim=in_dim, hidden=hidden, half=half, latent=latent,
                hid_p=hid_p, half_p=half_p, lat_p=lat_p)
    return (w1p, b1p, w2p, b2p, w3p, b3p), dims


# --------------------------------------------------------------------------- #
# VMEM budgeting + batch-tile selection (generation-aware).
# --------------------------------------------------------------------------- #
def _vmem_capacity_bytes():
    try:
        return int(pltpu.get_tpu_info().vmem_capacity_bytes)
    except Exception:
        return 64 << 20  # conservative per-TC fallback (v7x)


def _live_vmem_bytes(tb, in_dim, hid_p, half_p, lat_p, weight_bytes):
    x_bufs = 2 * tb * in_dim * 2            # double-buffered bf16 x tiles
    out_bufs = 2 * tb * lat_p * 4           # double-buffered f32 out tiles
    h1 = tb * hid_p * (4 + 2)               # f32 h1 + bf16 copy for next matmul
    h2 = tb * half_p * (4 + 2)              # f32 h2 + bf16 copy
    z = tb * lat_p * 4                      # f32 z / normalize temp
    return weight_bytes + x_bufs + out_bufs + h1 + h2 + z


def _choose_tb(batch, in_dim, hid_p, half_p, lat_p, weight_bytes, vmem_cap,
               block_batch):
    # Multiple of 16: bf16 packs 16 rows per vreg sublane tile.
    tb = _round_up(min(block_batch, _round_up(batch, 16)), 16)
    # Guarantee >= 2 grid steps for larger batches so the "parallel" batch axis
    # can actually split across v7x's two TensorCores.
    if batch > 16:
        tb = min(tb, _round_up(pl.cdiv(batch, 2), 16))
    # Shrink until the live set fits comfortably under the per-TC VMEM capacity.
    while tb > 16 and _live_vmem_bytes(tb, in_dim, hid_p, half_p, lat_p,
                                       weight_bytes) > int(vmem_cap * 0.7):
        tb = _round_up(tb // 2, 16)
    return max(tb, 16)
    # TODO(synk): for hidden_dim >= ~8k on v7x (64 MiB), chunk the hidden dim
    # with pltpu.emit_pipeline instead of shrinking TB below profitable sizes.


# --------------------------------------------------------------------------- #
# Forward wrapper.
# --------------------------------------------------------------------------- #
def encoder_roi_forward(x, prepared, *, block_batch=512):
    """Fused Encoder_ROI forward.  `prepared` = prepare_params(params).
    Returns (normalized_latent, None) like the PyTorch module."""
    (w1p, b1p, w2p, b2p, w3p, b3p), dims = prepared
    batch, in_dim = x.shape
    assert in_dim == dims["in_dim"]
    hid_p, half_p, lat_p = dims["hid_p"], dims["half_p"], dims["lat_p"]
    latent = dims["latent"]

    weight_bytes = sum(int(a.size * a.dtype.itemsize)
                       for a in (w1p, b1p, w2p, b2p, w3p, b3p))
    vmem_cap = _vmem_capacity_bytes()
    tb = _choose_tb(batch, in_dim, hid_p, half_p, lat_p, weight_bytes,
                    vmem_cap, block_batch)
    batch_p = _round_up(batch, tb)
    grid = (batch_p // tb,)

    # Only cast (MXU input dtype); pad only the batch remainder, only if needed.
    x_bf16 = x.astype(jnp.bfloat16)
    if batch_p != batch:
        x_bf16 = jnp.pad(x_bf16, ((0, batch_p - batch), (0, 0)))

    live = _live_vmem_bytes(tb, in_dim, hid_p, half_p, lat_p, weight_bytes)
    vmem_limit = int(min(vmem_cap, max(2 * live, 32 << 20)))

    flops = 2 * batch_p * (in_dim * hid_p + hid_p * half_p + half_p * lat_p)
    bytes_accessed = (batch_p * in_dim * 2) + weight_bytes + (batch_p * lat_p * 4)
    cost = pl.CostEstimate(flops=flops, transcendentals=batch_p,
                           bytes_accessed=bytes_accessed)

    const = lambda i: (0, 0)
    single = pl.Buffered(1)  # constant index_map -> one VMEM-resident copy

    out_p = pl.pallas_call(
        encoder_roi_kernel,
        out_shape=jax.ShapeDtypeStruct((batch_p, lat_p), jnp.float32),
        grid=grid,
        in_specs=[
            pl.BlockSpec((tb, in_dim), lambda i: (i, 0)),                # x tile
            pl.BlockSpec((in_dim, hid_p), const, pipeline_mode=single),  # w1
            pl.BlockSpec((1, hid_p), const, pipeline_mode=single),       # b1
            pl.BlockSpec((hid_p, half_p), const, pipeline_mode=single),  # w2
            pl.BlockSpec((1, half_p), const, pipeline_mode=single),      # b2
            pl.BlockSpec((half_p, lat_p), const, pipeline_mode=single),  # w3
            pl.BlockSpec((1, lat_p), const, pipeline_mode=single),       # b3
        ],
        out_specs=pl.BlockSpec((tb, lat_p), lambda i: (i, 0)),
        compiler_params=pltpu.CompilerParams(
            dimension_semantics=("parallel",),      # megacore split on v7x
            vmem_limit_bytes=vmem_limit,
        ),
        cost_estimate=cost,
    )(x_bf16, w1p, b1p, w2p, b2p, w3p, b3p)

    # Slice away batch padding and lane-padded latent columns.
    return out_p[:batch, :latent], None


# --------------------------------------------------------------------------- #
# Synthetic params + references.
# --------------------------------------------------------------------------- #
def init_params(key, in_dim, latent_dim, hidden_dim):
    """Deterministic synthetic parameters with the module's shapes (f32,
    stored as [in_features, out_features]; biases [1, out_features])."""
    k1, k2, k3, k4, k5, k6 = jax.random.split(key, 6)
    w1 = jax.random.normal(k1, (in_dim, hidden_dim), jnp.float32) * 0.1
    b1 = jax.random.normal(k2, (1, hidden_dim), jnp.float32) * 0.1
    w2 = jax.random.normal(k3, (hidden_dim, hidden_dim // 2), jnp.float32) * 0.1
    b2 = jax.random.normal(k4, (1, hidden_dim // 2), jnp.float32) * 0.1
    w3 = jax.random.normal(k5, (hidden_dim // 2, latent_dim), jnp.float32) * 0.1
    b3 = jax.random.normal(k6, (1, latent_dim), jnp.float32) * 0.1
    return (w1, b1, w2, b2, w3, b3)


def reference_forward(x, params):
    """Pure-JAX f32 reference mirroring the PyTorch forward."""
    w1, b1, w2, b2, w3, b3 = params
    h1 = jnp.maximum(x @ w1 + b1, 0.0)
    h2 = jnp.maximum(h1 @ w2 + b2, 0.0)
    z = h2 @ w3 + b3
    denom = jnp.maximum(jnp.sqrt(jnp.sum(z * z, axis=1, keepdims=True)), 1e-12)
    return z / denom


def reference_forward_bf16(x, params):
    """Reference with the same bf16-input / f32-accumulate matmuls as the kernel."""
    w1, b1, w2, b2, w3, b3 = params
    bf16 = jnp.bfloat16
    h1 = jnp.maximum(
        jnp.dot(x.astype(bf16), w1.astype(bf16),
                preferred_element_type=jnp.float32) + b1, 0.0)
    h2 = jnp.maximum(
        jnp.dot(h1.astype(bf16), w2.astype(bf16),
                preferred_element_type=jnp.float32) + b2, 0.0)
    z = jnp.dot(h2.astype(bf16), w3.astype(bf16),
                preferred_element_type=jnp.float32) + b3
    denom = jnp.maximum(jnp.sqrt(jnp.sum(z * z, axis=1, keepdims=True)), 1e-12)
    return z / denom


if __name__ == "__main__":
    # Small shapes consistent with Encoder_ROI(in_dim, latent_dim, hidden_dim)
    batch, in_dim, latent_dim, hidden_dim = 8, 32, 8, 32

    key = jax.random.PRNGKey(0)
    kx, kp = jax.random.split(key)
    x = jax.random.normal(kx, (batch, in_dim), jnp.float32)
    params = init_params(kp, in_dim, latent_dim, hidden_dim)

    prepared = prepare_params(params)          # pad + cast ONCE, reuse per call

    out, aux = encoder_roi_forward(x, prepared)
    out = jax.block_until_ready(out)

    assert aux is None
    assert out.shape == (batch, latent_dim)

    # Strict check vs a reference that uses the same bf16 matmul inputs.
    ref_bf16 = reference_forward_bf16(x, params)
    assert jnp.allclose(out, ref_bf16, atol=5e-3, rtol=5e-3), \
        "mismatch vs bf16-matmul reference"

    # Loose check vs the pure-f32 PyTorch-equivalent reference.
    ref_f32 = reference_forward(x, params)
    assert jnp.allclose(out, ref_f32, atol=3e-2, rtol=3e-2), \
        "mismatch vs f32 reference"

    print("KERNEL_OK")
</pallas_src>

<mosaic_0001>
module attributes {stable_mosaic.version = 11 : i64} {
  func.func @encoder_roi_kernel(%arg0: i32, %arg1: memref<16x32xbf16, #tpu.memory_space<vmem>>, %arg2: memref<32x128xbf16, #tpu.memory_space<vmem>>, %arg3: memref<1x128xf32, #tpu.memory_space<vmem>>, %arg4: memref<128x128xbf16, #tpu.memory_space<vmem>>, %arg5: memref<1x128xf32, #tpu.memory_space<vmem>>, %arg6: memref<128x128xbf16, #tpu.memory_space<vmem>>, %arg7: memref<1x128xf32, #tpu.memory_space<vmem>>, %arg8: memref<16x128xf32, #tpu.memory_space<vmem>>) attributes {dimension_semantics = [#tpu.dimension_semantics<parallel>], iteration_bounds = array<i64: 1>, scalar_prefetch = 0 : i64, scratch_operands = 0 : i64, tpu.core_type = #tpu.core_type<tc>, window_params = [{transform_indices = @transform_0, window_bounds = array<i64: 16, 32>}, {pipeline_mode = #tpu.pipeline_mode<synchronous>, transform_indices = @transform_1, window_bounds = array<i64: 32, 128>}, {pipeline_mode = #tpu.pipeline_mode<synchronous>, transform_indices = @transform_2, window_bounds = array<i64: 1, 128>}, {pipeline_mode = #tpu.pipeline_mode<synchronous>, transform_indices = @transform_3, window_bounds = array<i64: 128, 128>}, {pipeline_mode = #tpu.pipeline_mode<synchronous>, transform_indices = @transform_4, window_bounds = array<i64: 1, 128>}, {pipeline_mode = #tpu.pipeline_mode<synchronous>, transform_indices = @transform_5, window_bounds = array<i64: 128, 128>}, {pipeline_mode = #tpu.pipeline_mode<synchronous>, transform_indices = @transform_6, window_bounds = array<i64: 1, 128>}, {transform_indices = @transform_7, window_bounds = array<i64: 16, 128>}]} {
    %c0 = arith.constant 0 : index
    %c0_0 = arith.constant 0 : index
    %0 = vector.load %arg1[%c0, %c0_0] : memref<16x32xbf16, #tpu.memory_space<vmem>>, vector<16x32xbf16>
    %c0_1 = arith.constant 0 : index
    %c0_2 = arith.constant 0 : index
    %1 = vector.load %arg2[%c0_1, %c0_2] : memref<32x128xbf16, #tpu.memory_space<vmem>>, vector<32x128xbf16>
    %cst = arith.constant dense<0.000000e+00> : vector<16x128xf32>
    %2 = tpu.matmul %0, %1, %cst {dimension_numbers = #tpu.dot_dimension_numbers<[1], [0], [0], [1], [0, 0, 1, 1], [], []>} : vector<16x32xbf16>, vector<32x128xbf16>, vector<16x128xf32> -> vector<16x128xf32>
    %c0_3 = arith.constant 0 : index
    %c0_4 = arith.constant 0 : index
    %3 = vector.load %arg3[%c0_3, %c0_4] : memref<1x128xf32, #tpu.memory_space<vmem>>, vector<1x128xf32>
    %4 = vector.broadcast %3 : vector<1x128xf32> to vector<16x128xf32>
    %5 = arith.addf %2, %4 : vector<16x128xf32>
    %cst_5 = arith.constant 0.000000e+00 : f32
    %6 = vector.broadcast %cst_5 : f32 to vector<16x128xf32>
    %7 = arith.maximumf %5, %6 : vector<16x128xf32>
    %8 = arith.truncf %7 : vector<16x128xf32> to vector<16x128xbf16>
    %c0_6 = arith.constant 0 : index
    %c0_7 = arith.constant 0 : index
    %9 = vector.load %arg4[%c0_6, %c0_7] : memref<128x128xbf16, #tpu.memory_space<vmem>>, vector<128x128xbf16>
    %cst_8 = arith.constant dense<0.000000e+00> : vector<16x128xf32>
    %10 = tpu.matmul %8, %9, %cst_8 {dimension_numbers = #tpu.dot_dimension_numbers<[1], [0], [0], [1], [0, 0, 1, 1], [], []>} : vector<16x128xbf16>, vector<128x128xbf16>, vector<16x128xf32> -> vector<16x128xf32>
    %c0_9 = arith.constant 0 : index
    %c0_10 = arith.constant 0 : index
    %11 = vector.load %arg5[%c0_9, %c0_10] : memref<1x128xf32, #tpu.memory_space<vmem>>, vector<1x128xf32>
    %12 = vector.broadcast %11 : vector<1x128xf32> to vector<16x128xf32>
    %13 = arith.addf %10, %12 : vector<16x128xf32>
    %cst_11 = arith.constant 0.000000e+00 : f32
    %14 = vector.broadcast %cst_11 : f32 to vector<16x128xf32>
    %15 = arith.maximumf %13, %14 : vector<16x128xf32>
    %16 = arith.truncf %15 : vector<16x128xf32> to vector<16x128xbf16>
    %c0_12 = arith.constant 0 : index
    %c0_13 = arith.constant 0 : index
    %17 = vector.load %arg6[%c0_12, %c0_13] : memref<128x128xbf16, #tpu.memory_space<vmem>>, vector<128x128xbf16>
    %cst_14 = arith.constant dense<0.000000e+00> : vector<16x128xf32>
    %18 = tpu.matmul %16, %17, %cst_14 {dimension_numbers = #tpu.dot_dimension_numbers<[1], [0], [0], [1], [0, 0, 1, 1], [], []>} : vector<16x128xbf16>, vector<128x128xbf16>, vector<16x128xf32> -> vector<16x128xf32>
    %c0_15 = arith.constant 0 : index
    %c0_16 = arith.constant 0 : index
    %19 = vector.load %arg7[%c0_15, %c0_16] : memref<1x128xf32, #tpu.memory_space<vmem>>, vector<1x128xf32>
    %20 = vector.broadcast %19 : vector<1x128xf32> to vector<16x128xf32>
    %21 = arith.addf %18, %20 : vector<16x128xf32>
    %22 = arith.mulf %21, %21 : vector<16x128xf32>
    %cst_17 = arith.constant dense<0.000000e+00> : vector<16xf32>
    %23 = vector.multi_reduction <add>, %22, %cst_17 [1] : vector<16x128xf32> to vector<16xf32>
    %24 = vector.shape_cast %23 : vector<16xf32> to vector<16x1xf32>
    %cst_18 = arith.constant 1.000000e-24 : f32
    %25 = vector.broadcast %cst_18 : f32 to vector<16x1xf32>
    %26 = arith.maximumf %24, %25 : vector<16x1xf32>
    %27 = math.rsqrt %26 : vector<16x1xf32>
    %28 = vector.broadcast %27 : vector<16x1xf32> to vector<16x128xf32>
    %29 = arith.mulf %21, %28 : vector<16x128xf32>
    %c0_19 = arith.constant 0 : index
    %c0_20 = arith.constant 0 : index
    %30 = vector.load %arg8[%c0_19, %c0_20] : memref<16x128xf32, #tpu.memory_space<vmem>>, vector<16x128xf32>
    tpu.vector_store %arg8[%c0_19, %c0_20], %29 {strides = array<i32>} : memref<16x128xf32, #tpu.memory_space<vmem>>, vector<16x128xf32>,
    return
  }
  func.func @transform_0(%arg0: i32) -> (i32, i32) {
    %c0_i32 = arith.constant 0 : i32
    %c0_i32_0 = arith.constant 0 : i32
    return %arg0, %c0_i32 : i32, i32
  }
  func.func @transform_1(%arg0: i32) -> (i32, i32) {
    %c0_i32 = arith.constant 0 : i32
    %c0_i32_0 = arith.constant 0 : i32
    %c0_i32_1 = arith.constant 0 : i32
    return %c0_i32, %c0_i32_0 : i32, i32
  }
  func.func @transform_2(%arg0: i32) -> (i32, i32) {
    %c0_i32 = arith.constant 0 : i32
    %c0_i32_0 = arith.constant 0 : i32
    %c0_i32_1 = arith.constant 0 : i32
    return %c0_i32, %c0_i32_0 : i32, i32
  }
  func.func @transform_3(%arg0: i32) -> (i32, i32) {
    %c0_i32 = arith.constant 0 : i32
    %c0_i32_0 = arith.constant 0 : i32
    %c0_i32_1 = arith.constant 0 : i32
    return %c0_i32, %c0_i32_0 : i32, i32
  }
  func.func @transform_4(%arg0: i32) -> (i32, i32) {
    %c0_i32 = arith.constant 0 : i32
    %c0_i32_0 = arith.constant 0 : i32
    %c0_i32_1 = arith.constant 0 : i32
    return %c0_i32, %c0_i32_0 : i32, i32
  }
  func.func @transform_5(%arg0: i32) -> (i32, i32) {
    %c0_i32 = arith.constant 0 : i32
    %c0_i32_0 = arith.constant 0 : i32
    %c0_i32_1 = arith.constant 0 : i32
    return %c0_i32, %c0_i32_0 : i32, i32
  }
  func.func @transform_6(%arg0: i32) -> (i32, i32) {
    %c0_i32 = arith.constant 0 : i32
    %c0_i32_0 = arith.constant 0 : i32
    %c0_i32_1 = arith.constant 0 : i32
    return %c0_i32, %c0_i32_0 : i32, i32
  }
  func.func @transform_7(%arg0: i32) -> (i32, i32) {
    %c0_i32 = arith.constant 0 : i32
    %c0_i32_0 = arith.constant 0 : i32
    return %arg0, %c0_i32 : i32, i32
  }
}

</mosaic_0001>

<bundles_post_ra>
// kernel: tpu_custom_call.1
= control target key start
LH: loop header
LB: loop body
LE: loop exit
PB: predicated region body
PF: predicated region fallthrough
CT: control target
= control target key end

     0   :  { %12 = vsyncpa [#allocation3], 0  ;;  %s835_s0 = inlined_call_operand.hbm [shape: bf16[16,32], index: 0, kind: input, shape index: {}]   ;;  %s836_s1 = inlined_call_operand.hbm [shape: bf16[32,128], index: 1, kind: input, shape index: {}]   ;;  %s837_s2 = inlined_call_operand.vmem [shape: f32[1,128], index: 2, kind: input, shape index: {}]   ;;  %s838_s3 = inlined_call_operand.hbm [shape: bf16[128,128], index: 3, kind: input, shape index: {}]   ;;  %s839_s4 = inlined_call_operand.vmem [shape: f32[1,128], index: 4, kind: input, shape index: {}]   ;;  %s840_s5 = inlined_call_operand.hbm [shape: bf16[128,128], index: 5, kind: input, shape index: {}]   ;;  %s841_s6 = inlined_call_operand.vmem [shape: f32[1,128], index: 6, kind: input, shape index: {}]   ;;  %s842_s7 = inlined_call_operand.hbm [shape: f32[16,128], index: 7, kind: output, shape index: {}]  }
   0x1   :  { %13 = vsyncpa [#allocation6], 0 }
   0x2   :  { %14 = vsyncpa [#allocation9], 0 }
   0x3   :  { %15 = vsyncpa [#allocation4], 0  ;;  %s665_s24 = smov [#allocation5]   ;;  %s666_s26 = smov [#allocation2]  }
   0x4   :  { %s33_s25 = sshll.u32 %s665_s24, 4  ;;  %s21_s27 = sshll.u32 %s666_s26, 4  ;;  %s34_s25 = int_to_ptr.vmem [resolvable:$true] %s33_s25  ;;  %s716_s27 = int_to_ptr.vmem [resolvable:$true] %s21_s27 }
   0x5   :  { %s547_s30 = scalar_lea.hbm %s836_s1, 256 }
   0x6   :  { %p548_p0 = scmp.ne.s32.totalorder %s836_s1, %s547_s30  ;;  %p551_p1 = scmp.lt.u32.totalorder %s547_s30, %s836_s1 }
   0x8   :  { %p553_p2 = pnand %p551_p1, %p548_p0 }
   0xa   :  { %556 = shalt.err (!%p553_p2)
}
   0xb   :  { %s557_s12 = scalar_lea.vmem %s34_s25, 256  ;;  %p562_p4 = scmp.lt.s32.totalorder %s34_s25, %s34_s25 }
   0xc   :  { %p558_p3 = scmp.ne.s32.totalorder %s34_s25, %s557_s12  ;;  %p563_p5 = scmp.lt.s32.totalorder %s557_s12, %s557_s12 }
   0xe   :  { %p564_p6 = por %p563_p5, %p562_p4 }
  0x10   :  { %p565_p7 = pnand %p564_p6, %p558_p3 }
  0x12   :  { %568 = shalt.err (!%p565_p7)
}
  0x13   :  { %s667_s13 = smov 64   ;;  %s668_s14 = smov 4  }
  0x14   :  { %39 = dma.hbm_to_vmem [thread:$0]  %s836_s1, 256, %s34_s25, [#allocation6], %s667_s13, %s667_s13, %s668_s14  }
  0x15   :  { %s569_s19 = scalar_lea.hbm %s835_s0, 128 }
  0x16   :  { %p570_p8 = scmp.ne.s32.totalorder %s835_s0, %s569_s19  ;;  %p573_p9 = scmp.lt.u32.totalorder %s569_s19, %s835_s0 }
  0x18   :  { %p575_p10 = pnand %p573_p9, %p570_p8 }
  0x1a   :  { %578 = shalt.err (!%p575_p10)
}
  0x1b   :  { %s579_s24 = scalar_lea.vmem %s716_s27, 128  ;;  %p584_p12 = scmp.lt.s32.totalorder %s716_s27, %s716_s27 }
  0x1c   :  { %p580_p11 = scmp.ne.s32.totalorder %s716_s27, %s579_s24  ;;  %p585_p13 = scmp.lt.s32.totalorder %s579_s24, %s579_s24 }
  0x1e   :  { %p586_p0 = por %p585_p13, %p584_p12 }
  0x20   :  { %p587_p1 = pnand %p586_p0, %p580_p11 }
  0x22   :  { %590 = shalt.err (!%p587_p1)
}
  0x23   :  { %27 = dma.hbm_to_vmem [thread:$0]  %s835_s0, 128, %s716_s27, [#allocation3], %s667_s13, %s667_s13, %s668_s14  }
  0x24   :  { %s669_s26 = smov [#allocation7]   ;;  %s670_s29 = smov [#allocation8]  }
  0x25   :  { %s47_s28 = sshll.u32 %s669_s26, 4  ;;  %s61_s30 = sshll.u32 %s670_s29, 4  ;;  %s48_s28 = int_to_ptr.vmem [resolvable:$true] %s47_s28  ;;  %s753_s30 = int_to_ptr.vmem [resolvable:$true] %s61_s30 }
  0x26   :  { %s591_s10 = scalar_lea.hbm %s838_s3, 1024 }
  0x27   :  { %p592_p2 = scmp.ne.s32.totalorder %s838_s3, %s591_s10  ;;  %p595_p3 = scmp.lt.u32.totalorder %s591_s10, %s838_s3 }
  0x29   :  { %p597_p4 = pnand %p595_p3, %p592_p2 }
  0x2b   :  { %600 = shalt.err (!%p597_p4)
}
  0x2c   :  { %s601_s0 = scalar_lea.vmem %s48_s28, 1024  ;;  %p606_p6 = scmp.lt.s32.totalorder %s48_s28, %s48_s28 }
  0x2d   :  { %p602_p5 = scmp.ne.s32.totalorder %s48_s28, %s601_s0  ;;  %p607_p7 = scmp.lt.s32.totalorder %s601_s0, %s601_s0 }
  0x2f   :  { %p608_p8 = por %p607_p7, %p606_p6 }
  0x31   :  { %p609_p9 = pnand %p608_p8, %p602_p5 }
  0x33   :  { %612 = shalt.err (!%p609_p9)
}
  0x34   :  { %53 = dma.hbm_to_vmem [thread:$0]  %s838_s3, 1024, %s48_s28, [#allocation6], %s667_s13, %s667_s13, %s668_s14  }
  0x35   :  { %s613_s20 = scalar_lea.hbm %s840_s5, 1024 }
  0x36   :  { %p614_p10 = scmp.ne.s32.totalorder %s840_s5, %s613_s20  ;;  %p617_p11 = scmp.lt.u32.totalorder %s613_s20, %s840_s5 }
  0x38   :  { %p619_p12 = pnand %p617_p11, %p614_p10 }
  0x3a   :  { %622 = shalt.err (!%p619_p12)
}
  0x3b   :  { %s623_s1 = scalar_lea.vmem %s753_s30, 1024  ;;  %p628_p0 = scmp.lt.s32.totalorder %s753_s30, %s753_s30 }
  0x3c   :  { %p624_p13 = scmp.ne.s32.totalorder %s753_s30, %s623_s1  ;;  %p629_p1 = scmp.lt.s32.totalorder %s623_s1, %s623_s1 }
  0x3e   :  { %p630_p2 = por %p629_p1, %p628_p0 }
  0x40   :  { %p631_p3 = pnand %p630_p2, %p624_p13 }
  0x42   :  { %634 = shalt.err (!%p631_p3)
}
  0x43   :  { %67 = dma.hbm_to_vmem [thread:$0]  %s840_s5, 1024, %s753_s30, [#allocation9], %s667_s13, %s667_s13, %s668_s14  }
  0x44   :  { %657 = dma.done.wait [#allocation3], 128  }
  0x45   :  { %658 = vsyncadd [#allocation3], 4294967168 }
  0x46   :  { %659 = dma.done.wait [#allocation6], 1280  }
  0x47   :  { %660 = vsyncadd [#allocation6], 4294966016 }
  0x48   :  { %661 = dma.done.wait [#allocation9], 1024  }
  0x49   :  { %662 = vsyncadd [#allocation9], 4294966272  ;;  %v671_v0 = vmov 0.0   ;;  %vm672_vm0 = vmmov 0   ;;  %v524_v1 = vld [vmem:[#allocation5] sm:$0xff]   ;;  %v525_v2 = vld [vmem:[#allocation5 + $0x8] sm:$0xff]  }
  0x4a   :  { %465 = vmatprep.subr.bf16.mxu0 %v671_v0  ;;  %469 = vmatprep.mubr.msk.bf16.mxu0 %vm672_vm0, %v671_v0  ;;  %v527_v3 = vld [vmem:[#allocation7] sm:$0xff]   ;;  %v526_v4 = vld [vmem:[#allocation2] sm:$0xff]   ;;  %vm113_vm1 = vcmask 261120   ;;  %v529_v6 = vld [vmem:[#allocation7 + $0x10] sm:$0xff]  }
  0x4b   :  { %473 = vmatprep.subr.bf16.mxu1 %v671_v0  ;;  %489 = vmatprep.mubr.msk.bf16.mxu1 %vm672_vm0, %v671_v0  ;;  %v528_v5 = vld [vmem:[#allocation7 + $0x8] sm:$0xff]   ;;  %v530_v7 = vld [vmem:[#allocation7 + $0x18] sm:$0xff]   ;;  %v531_v8 = vld [vmem:[#allocation7 + $0x20] sm:$0xff]  }
  0x4c   :  { %466 = vmatpush3.bf16.msra.mxu0 %v524_v1  ;;  %474 = vmatpush3.bf16.msra.mxu1 %v527_v3  ;;  %v532_v9 = vld [vmem:[#allocation7 + $0x28] sm:$0xff]   ;;  %v533_v10 = vld [vmem:[#allocation7 + $0x30] sm:$0xff]   ;;  %v534_v11 = vld [vmem:[#allocation7 + $0x38] sm:$0xff]  }
  0x4d   :  { %467 = vmatprep.subr.bf16.mxu0 %v671_v0  ;;  %475 = vmatprep.subr.bf16.mxu1 %v671_v0  ;;  %v535_v12 = vld [vmem:[#allocation8] sm:$0xff]   ;;  %v536_v13 = vld [vmem:[#allocation8 + $0x8] sm:$0xff]   ;;  %v537_v14 = vld [vmem:[#allocation8 + $0x10] sm:$0xff]  }
  0x4e   :  { %v538_v15 = vld [vmem:[#allocation8 + $0x18] sm:$0xff]   ;;  %v539_v16 = vld [vmem:[#allocation8 + $0x20] sm:$0xff]   ;;  %v540_v17 = vld [vmem:[#allocation8 + $0x28] sm:$0xff]  }
  0x4f   :  { %v421_v18 = vld [vmem:[%s837_s2] ss:$0 sm:$0xff]  ;;  %v541_v28 = vld [vmem:[#allocation8 + $0x30] sm:$0xff]   ;;  %v542_v29 = vld [vmem:[#allocation8 + $0x38] sm:$0xff]  }
  0x50   :  { %468 = vmatpush3.bf16.msra.mxu0 %v525_v2  ;;  %476 = vmatpush3.bf16.msra.mxu1 %v528_v5  ;;  %v426_v30 = vld [vmem:[%s839_s4] ss:$0 sm:$0xff]  ;;  %s673_s4 = smov [#allocation10]  }
  0x51   :  { %493 = vmatprep.subr.bf16.mxu0 %v671_v0  ;;  %477 = vmatprep.subr.bf16.mxu1 %v671_v0  ;;  %v435_v40 = vld [vmem:[%s841_s6] ss:$0 sm:$0xff]  ;;  %s407_s6 = sshll.u32 %s673_s4, 4  ;;  %s408_s6 = int_to_ptr.vmem [resolvable:$true] %s407_s6 }
  0x52   :  { %s635_s29 = scalar_lea.vmem %s408_s6, 256  ;;  %p640_p5 = scmp.lt.s32.totalorder %s408_s6, %s408_s6 }
  0x53   :  { %470 = vmatmul.mubr.msk.bf16.vlgmr.msra.gmra.mrb[0].mxu0 %vm113_vm1, %v526_v4  ;;  %p636_p4 = scmp.ne.s32.totalorder %s408_s6, %s635_s29  ;;  %p641_p6 = scmp.lt.s32.totalorder %s635_s29, %s635_s29 }
  0x54   :  { %509 = vmatprep.mubr.msk.bf16.mxu0 %vm672_vm0, %v671_v0  ;;  %478 = vmatpush3.bf16.msra.mxu1 %v529_v6 }
  0x55   :  { %479 = vmatprep.subr.bf16.mxu1 %v671_v0  ;;  %494 = vmatpush3.bf16.msra.mxu0 %v535_v12  ;;  %p642_p7 = por %p641_p6, %p640_p5 }
  0x56   :  { %495 = vmatprep.subr.bf16.mxu0 %v671_v0 }
  0x57   :  { %p643_p8 = pnand %p642_p7, %p636_p4 }
  0x58   :  { %480 = vmatpush3.bf16.msra.mxu1 %v530_v7 }
  0x59   :  { %481 = vmatprep.subr.bf16.mxu1 %v671_v0  ;;  %496 = vmatpush3.bf16.msra.mxu0 %v536_v13 }
  0x5a   :  { %497 = vmatprep.subr.bf16.mxu0 %v671_v0 }
  0x5c   :  { %482 = vmatpush3.bf16.msra.mxu1 %v531_v8 }
  0x5d   :  { %483 = vmatprep.subr.bf16.mxu1 %v671_v0  ;;  %498 = vmatpush3.bf16.msra.mxu0 %v537_v14 }
  0x5e   :  { %499 = vmatprep.subr.bf16.mxu0 %v671_v0 }
  0x60   :  { %484 = vmatpush3.bf16.msra.mxu1 %v532_v9 }
  0x61   :  { %485 = vmatprep.subr.bf16.mxu1 %v671_v0  ;;  %500 = vmatpush3.bf16.msra.mxu0 %v538_v15 }
  0x62   :  { %501 = vmatprep.subr.bf16.mxu0 %v671_v0 }
  0x64   :  { %486 = vmatpush3.bf16.msra.mxu1 %v533_v10 }
  0x65   :  { %487 = vmatprep.subr.bf16.mxu1 %v671_v0  ;;  %502 = vmatpush3.bf16.msra.mxu0 %v539_v16 }
  0x66   :  { %503 = vmatprep.subr.bf16.mxu0 %v671_v0 }
  0x68   :  { %488 = vmatpush3.bf16.msra.mxu1 %v534_v11 }
  0x69   :  { %504 = vmatpush3.bf16.msra.mxu0 %v540_v17 }
  0x6a   :  { %505 = vmatprep.subr.bf16.mxu0 %v671_v0 }
  0x6d   :  { %506 = vmatpush3.bf16.msra.mxu0 %v541_v28 }
  0x6e   :  { %507 = vmatprep.subr.bf16.mxu0 %v671_v0 }
  0x71   :  { %508 = vmatpush3.bf16.msra.mxu0 %v542_v29 }
 0x126   :  { %v151_v19 = vpop.f32.mrb[0].mxu0 }
 0x127   :  { %v152_v20 = vadd.f32 %v421_v18, %v151_v19  ;;  %v471_v21 = vpop.f32.mrb[1].mxu0 }
 0x128   :  { %v154_v22 = vpop.f32.mrb[2].mxu0 }
 0x129   :  { %v155_v23 = vadd.f32 %v421_v18, %v154_v22  ;;  %v472_v24 = vpop.f32.mrb[3].mxu0  ;;  %v158_v25 = vmax.f32 %v152_v20, 0.0 }
 0x12b   :  { %v159_v26 = vmax.f32 %v155_v23, 0.0 }
 0x12d   :  { %v160_v27 = vpack.c.bf16 %v159_v26, %v158_v25 }
 0x12f   :  { %490 = vmatmul.mubr.bf16.vlgmr.msra.gmra.mrb[0].mxu1 %v160_v27 }
 0x202   :  { %v266_v31 = vpop.f32.mrb[0].mxu1 }
 0x203   :  { %v267_v32 = vadd.f32 %v426_v30, %v266_v31  ;;  %v491_v33 = vpop.f32.mrb[1].mxu1 }
 0x204   :  { %v269_v34 = vpop.f32.mrb[2].mxu1 }
 0x205   :  { %v270_v35 = vadd.f32 %v426_v30, %v269_v34  ;;  %v492_v36 = vpop.f32.mrb[3].mxu1  ;;  %v273_v37 = vmax.f32 %v267_v32, 0.0 }
 0x207   :  { %v274_v38 = vmax.f32 %v270_v35, 0.0 }
 0x209   :  { %v275_v39 = vpack.c.bf16 %v274_v38, %v273_v37 }
 0x20b   :  { %510 = vmatmul.mubr.bf16.vlgmr.msra.gmra.mrb[4].mxu0 %v275_v39 }
 0x2de   :  { %v381_v41 = vpop.f32.mrb[4].mxu0 }
 0x2df   :  { %v382_v42 = vadd.f32 %v435_v40, %v381_v41  ;;  %v511_v43 = vpop.f32.mrb[5].mxu0 }
 0x2e0   :  { %v384_v44 = vpop.f32.mrb[6].mxu0 }
 0x2e1   :  { %v385_v45 = vadd.f32 %v435_v40, %v384_v44  ;;  %v512_v46 = vpop.f32.mrb[7].mxu0  ;;  %v388_v47 = vmul.f32 %v382_v42, %v382_v42 }
 0x2e3   :  { %390 = vadd.xlane.f32.xlu0 %v388_v47  ;;  %v389_v48 = vmul.f32 %v385_v45, %v385_v45 }
 0x2e7   :  { %392 = vadd.xlane.f32.xlu0 %v389_v48 }
 0x370   :  { %v391_v49 = vpop.xlane.xlu0 %390 }
 0x371   :  { %v394_v50 = vmax.f32 %v391_v49, 1e-24 }
 0x373   :  { %543 = vrsqrt.f32 %v394_v50 }
 0x374   :  { %v393_v51 = vpop.xlane.xlu0 %392 }
 0x375   :  { %v395_v52 = vmax.f32 %v393_v51, 1e-24 }
 0x377   :  { %545 = vrsqrt.f32 %v395_v52 }
 0x37d   :  { %v544_v53 = vpop.eup %543 }
 0x37e   :  { %v398_v54 = vmul.f32 %v544_v53, %v382_v42 }
 0x380   :  { %400 = vst [vmem:[#allocation10] sm:$0xff] %v398_v54 }
 0x381   :  { %v546_v55 = vpop.eup %545 }
 0x382   :  { %v399_v56 = vmul.f32 %v546_v55, %v385_v45 }
 0x384   :  { %401 = vst [vmem:[#allocation10 + $0x8] sm:$0xff] %v399_v56 }
 0x385   :  { %646 = shalt.err (!%p643_p8)
}
 0x386   :  { %s647_s9 = scalar_lea.hbm %s842_s7, 256 }
 0x387   :  { %p648_p9 = scmp.ne.s32.totalorder %s842_s7, %s647_s9  ;;  %p651_p10 = scmp.lt.u32.totalorder %s647_s9, %s842_s7 }
 0x389   :  { %p653_p11 = pnand %p651_p10, %p648_p9 }
 0x38b   :  { %656 = shalt.err (!%p653_p11)
}
 0x38c   :  { %s674_s16 = smov 128   ;;  %s675_s0 = smov 8  }
 0x38d   :  { %413 = dma.vmem_to_hbm [thread:$0]  %s408_s6, 256, %s842_s7, [#allocation4], %s674_s16, %s674_s16, %s675_s0  }
 0x38e   :  { %663 = dma.done.wait [#allocation4], 256  }
 0x38f   :  { %664 = vsyncadd [#allocation4], 4294967040 }
 0x390   :  { %417 = vsyncpa [#allocation3], 1 }
 0x391   :  { %418 = vsyncpa [#allocation6], 1 }
 0x392   :  { %419 = vsyncpa [#allocation9], 1 }
 0x393   :  { %420 = vsyncpa [#allocation4], 1 }

</bundles_post_ra>
